<compile_context>
chip_gen: v7x
topology: tpu7x:2x2x1
jax: 0.10.0
libtpu: 0.0.40
codegen_flags: <defaults>
</compile_context>

<pallas_src>
import jax
import jax.numpy as jnp
from jax.experimental import pallas as pl
from jax.experimental.pallas import tpu as pltpu

BN_EPS = 1e-5
H1, H2, H3, H3P = 256, 128, 64, 128   # hidden widths; H3 padded to a lane tile


def _round_up(a, m):
    return (a + m - 1) // m * m


def ann_stack_kernel(x_ref, w1_ref, w2_ref, w3_ref, w4_ref, vec_ref, out_ref):
    """Whole forward pass for one batch tile: 4 MXU matmuls + fused BN/ReLU.

    vec_ref rows: 0=s1, 1=o1, 2=s2, 3=o2, 4=s3, 5=o3, 6=b4 (all bias-folded,
    zero-padded to lane-dense widths).
    """
    f32 = jnp.float32
    bf16 = jnp.bfloat16
    c_pad = out_ref.shape[-1]

    x = x_ref[...]                                              # bf16 (tb, F)

    # fc1 -> bn1 -> relu     (dropout1 = identity in eval mode)
    h = jnp.dot(x, w1_ref[...], preferred_element_type=f32)
    h = jnp.maximum(h * vec_ref[0:1, :H1] + vec_ref[1:2, :H1], 0.0)

    # fc2 -> bn2 -> relu     (dropout2 = identity in eval mode)
    h = jnp.dot(h.astype(bf16), w2_ref[...], preferred_element_type=f32)
    h = jnp.maximum(h * vec_ref[2:3, :H2] + vec_ref[3:4, :H2], 0.0)

    # fc3 -> bn3 -> relu     (hidden padded 64 -> 128; padded lanes stay 0)
    h = jnp.dot(h.astype(bf16), w3_ref[...], preferred_element_type=f32)
    h = jnp.maximum(h * vec_ref[4:5, :H3P] + vec_ref[5:6, :H3P], 0.0)

    # out (final bias lives in packed row 6, padded to the lane-dense width)
    out = jnp.dot(h.astype(bf16), w4_ref[...], preferred_element_type=f32)
    out_ref[...] = (out + vec_ref[6:7, :c_pad]).astype(out_ref.dtype)

    # TODO(synk): Dropout(0.2) is stochastic in train mode; eval mode => identity.


def init_raw_params(key, input_size, num_classes):
    """Deterministic synthetic params matching TunedCategoryANN.__init__ (eval mode)."""
    dims = [(input_size, H1), (H1, H2), (H2, H3), (H3, num_classes)]
    keys = iter(jax.random.split(key, 20))
    raw = {}
    for li, (fi, fo) in enumerate(dims, start=1):
        bound = 1.0 / (fi ** 0.5)
        raw[f"w{li}"] = jax.random.uniform(next(keys), (fi, fo), jnp.float32,
                                           -bound, bound)       # (in, out) layout
        raw[f"b{li}"] = jax.random.uniform(next(keys), (fo,), jnp.float32,
                                           -bound, bound)
    for li, (_, fo) in enumerate(dims[:3], start=1):            # bn1..bn3
        raw[f"g{li}"] = 1.0 + 0.1 * jax.random.normal(next(keys), (fo,), jnp.float32)
        raw[f"be{li}"] = 0.1 * jax.random.normal(next(keys), (fo,), jnp.float32)
        raw[f"rm{li}"] = 0.1 * jax.random.normal(next(keys), (fo,), jnp.float32)
        raw[f"rv{li}"] = jnp.abs(1.0 + 0.1 * jax.random.normal(next(keys), (fo,),
                                                               jnp.float32))
    return raw


def prepare_kernel_params(raw, num_classes):
    """Fold BN + biases, pad to lane-dense widths, cast matmul weights to bf16."""
    c_pad = max(128, _round_up(num_classes, 128))
    vw = max(H1, c_pad)

    w3 = jnp.zeros((H2, H3P), jnp.float32).at[:, :H3].set(raw["w3"])
    w4 = jnp.zeros((H3P, c_pad), jnp.float32).at[:H3, :num_classes].set(raw["w4"])

    kp = {
        "w1": raw["w1"].astype(jnp.bfloat16),
        "w2": raw["w2"].astype(jnp.bfloat16),
        "w3": w3.astype(jnp.bfloat16),
        "w4": w4.astype(jnp.bfloat16),
        "c_pad": c_pad,
    }

    # Pack BN scale/offset (with Linear bias folded in) + final bias into one array.
    vec = jnp.zeros((8, vw), jnp.float32)
    for li, width in ((1, H1), (2, H2), (3, H3)):
        s = raw[f"g{li}"] / jnp.sqrt(raw[f"rv{li}"] + BN_EPS)
        o = (raw[f"b{li}"] - raw[f"rm{li}"]) * s + raw[f"be{li}"]
        vec = vec.at[2 * (li - 1), :width].set(s)
        vec = vec.at[2 * li - 1, :width].set(o)
    vec = vec.at[6, :num_classes].set(raw["b4"])
    kp["vec"] = vec
    return kp


def tuned_category_ann_forward(x, kp, num_classes, *, tb=512):
    B, F = x.shape
    c_pad = kp["c_pad"]
    w1, w2, w3, w4, vec = kp["w1"], kp["w2"], kp["w3"], kp["w4"], kp["vec"]

    # Choose a large batch tile; keep >= 2 grid steps when possible (v7x megacore).
    b8 = _round_up(B, 8)
    tb_eff = max(8, min(_round_up(tb, 8), b8))
    grid = pl.cdiv(b8, tb_eff)
    if grid < 2 and b8 >= 16:
        tb_eff = max(8, (b8 // 2 // 8) * 8)
        grid = pl.cdiv(b8, tb_eff)
    b_pad = grid * tb_eff

    xb = x.astype(jnp.bfloat16)                 # halve HBM->VMEM bytes for x
    if b_pad != B:
        xb = jnp.pad(xb, ((0, b_pad - B), (0, 0)))

    out = pl.pallas_call(
        ann_stack_kernel,
        out_shape=jax.ShapeDtypeStruct((b_pad, c_pad), jnp.float32),
        grid=(grid,),
        in_specs=[
            pl.BlockSpec((tb_eff, F), lambda i: (i, 0)),
            pl.BlockSpec(w1.shape, lambda i: (0, 0)),
            pl.BlockSpec(w2.shape, lambda i: (0, 0)),
            pl.BlockSpec(w3.shape, lambda i: (0, 0)),
            pl.BlockSpec(w4.shape, lambda i: (0, 0)),
            pl.BlockSpec(vec.shape, lambda i: (0, 0)),
        ],
        out_specs=pl.BlockSpec((tb_eff, c_pad), lambda i: (i, 0)),
        compiler_params=pltpu.CompilerParams(
            dimension_semantics=("parallel",)),
    )(xb, w1, w2, w3, w4, vec)
    return out[:B, :num_classes]


def reference_forward(x, raw):
    """Pure-JAX f32 reference with unfolded PyTorch eval-mode semantics."""
    def bn(h, li):
        s = raw[f"g{li}"] / jnp.sqrt(raw[f"rv{li}"] + BN_EPS)
        return (h - raw[f"rm{li}"]) * s + raw[f"be{li}"]

    h = jnp.maximum(bn(x @ raw["w1"] + raw["b1"], 1), 0.0)
    h = jnp.maximum(bn(h @ raw["w2"] + raw["b2"], 2), 0.0)
    h = jnp.maximum(bn(h @ raw["w3"] + raw["b3"], 3), 0.0)
    return h @ raw["w4"] + raw["b4"]


if __name__ == "__main__":
    key = jax.random.PRNGKey(0)
    k_x, k_p = jax.random.split(key)

    batch = 256
    input_size = 32
    num_classes = 10

    x = jax.random.normal(k_x, (batch, input_size), jnp.float32)
    raw = init_raw_params(k_p, input_size, num_classes)
    kp = prepare_kernel_params(raw, num_classes)

    out = tuned_category_ann_forward(x, kp, num_classes, tb=512)
    out = jax.block_until_ready(out)

    ref = reference_forward(x, raw)
    assert out.shape == (batch, num_classes)
    # bf16 MXU operands vs pure-f32 reference -> modest tolerance.
    assert jnp.allclose(out, ref, atol=5e-2, rtol=5e-2), "mismatch vs reference"

    print("KERNEL_OK")
</pallas_src>

<mosaic_0001>
module attributes {stable_mosaic.version = 11 : i64} {
  func.func @ann_stack_kernel(%arg0: i32, %arg1: memref<128x32xbf16, #tpu.memory_space<vmem>>, %arg2: memref<32x256xbf16, #tpu.memory_space<vmem>>, %arg3: memref<256x128xbf16, #tpu.memory_space<vmem>>, %arg4: memref<128x128xbf16, #tpu.memory_space<vmem>>, %arg5: memref<128x128xbf16, #tpu.memory_space<vmem>>, %arg6: memref<8x256xf32, #tpu.memory_space<vmem>>, %arg7: memref<128x128xf32, #tpu.memory_space<vmem>>) attributes {dimension_semantics = [#tpu.dimension_semantics<parallel>], iteration_bounds = array<i64: 2>, scalar_prefetch = 0 : i64, scratch_operands = 0 : i64, tpu.core_type = #tpu.core_type<tc>, window_params = [{transform_indices = @transform_0, window_bounds = array<i64: 128, 32>}, {pipeline_mode = #tpu.pipeline_mode<synchronous>, transform_indices = @transform_1, window_bounds = array<i64: 32, 256>}, {pipeline_mode = #tpu.pipeline_mode<synchronous>, transform_indices = @transform_2, window_bounds = array<i64: 256, 128>}, {pipeline_mode = #tpu.pipeline_mode<synchronous>, transform_indices = @transform_3, window_bounds = array<i64: 128, 128>}, {pipeline_mode = #tpu.pipeline_mode<synchronous>, transform_indices = @transform_4, window_bounds = array<i64: 128, 128>}, {pipeline_mode = #tpu.pipeline_mode<synchronous>, transform_indices = @transform_5, window_bounds = array<i64: 8, 256>}, {transform_indices = @transform_6, window_bounds = array<i64: 128, 128>}]} {
    %c0 = arith.constant 0 : index
    %c0_0 = arith.constant 0 : index
    %0 = vector.load %arg1[%c0, %c0_0] : memref<128x32xbf16, #tpu.memory_space<vmem>>, vector<128x32xbf16>
    %c0_1 = arith.constant 0 : index
    %c0_2 = arith.constant 0 : index
    %1 = vector.load %arg2[%c0_1, %c0_2] : memref<32x256xbf16, #tpu.memory_space<vmem>>, vector<32x256xbf16>
    %cst = arith.constant dense<0.000000e+00> : vector<128x256xf32>
    %2 = tpu.matmul %0, %1, %cst {dimension_numbers = #tpu.dot_dimension_numbers<[1], [0], [0], [1], [0, 0, 1, 1], [], []>} : vector<128x32xbf16>, vector<32x256xbf16>, vector<128x256xf32> -> vector<128x256xf32>
    %c0_3 = arith.constant 0 : index
    %c0_4 = arith.constant 0 : index
    %3 = vector.load %arg6[%c0_3, %c0_4] : memref<8x256xf32, #tpu.memory_space<vmem>>, vector<1x256xf32>
    %4 = vector.broadcast %3 : vector<1x256xf32> to vector<128x256xf32>
    %5 = arith.mulf %2, %4 : vector<128x256xf32>
    %c1 = arith.constant 1 : index
    %c0_5 = arith.constant 0 : index
    %6 = vector.load %arg6[%c1, %c0_5] : memref<8x256xf32, #tpu.memory_space<vmem>>, vector<1x256xf32>
    %7 = vector.broadcast %6 : vector<1x256xf32> to vector<128x256xf32>
    %8 = arith.addf %5, %7 : vector<128x256xf32>
    %cst_6 = arith.constant 0.000000e+00 : f32
    %9 = vector.broadcast %cst_6 : f32 to vector<128x256xf32>
    %10 = arith.maximumf %8, %9 : vector<128x256xf32>
    %11 = arith.truncf %10 : vector<128x256xf32> to vector<128x256xbf16>
    %c0_7 = arith.constant 0 : index
    %c0_8 = arith.constant 0 : index
    %12 = vector.load %arg3[%c0_7, %c0_8] : memref<256x128xbf16, #tpu.memory_space<vmem>>, vector<256x128xbf16>
    %cst_9 = arith.constant dense<0.000000e+00> : vector<128x128xf32>
    %13 = tpu.matmul %11, %12, %cst_9 {dimension_numbers = #tpu.dot_dimension_numbers<[1], [0], [0], [1], [0, 0, 1, 1], [], []>} : vector<128x256xbf16>, vector<256x128xbf16>, vector<128x128xf32> -> vector<128x128xf32>
    %c2 = arith.constant 2 : index
    %c0_10 = arith.constant 0 : index
    %14 = vector.load %arg6[%c2, %c0_10] : memref<8x256xf32, #tpu.memory_space<vmem>>, vector<1x128xf32>
    %15 = vector.broadcast %14 : vector<1x128xf32> to vector<128x128xf32>
    %16 = arith.mulf %13, %15 : vector<128x128xf32>
    %c3 = arith.constant 3 : index
    %c0_11 = arith.constant 0 : index
    %17 = vector.load %arg6[%c3, %c0_11] : memref<8x256xf32, #tpu.memory_space<vmem>>, vector<1x128xf32>
    %18 = vector.broadcast %17 : vector<1x128xf32> to vector<128x128xf32>
    %19 = arith.addf %16, %18 : vector<128x128xf32>
    %cst_12 = arith.constant 0.000000e+00 : f32
    %20 = vector.broadcast %cst_12 : f32 to vector<128x128xf32>
    %21 = arith.maximumf %19, %20 : vector<128x128xf32>
    %22 = arith.truncf %21 : vector<128x128xf32> to vector<128x128xbf16>
    %c0_13 = arith.constant 0 : index
    %c0_14 = arith.constant 0 : index
    %23 = vector.load %arg4[%c0_13, %c0_14] : memref<128x128xbf16, #tpu.memory_space<vmem>>, vector<128x128xbf16>
    %cst_15 = arith.constant dense<0.000000e+00> : vector<128x128xf32>
    %24 = tpu.matmul %22, %23, %cst_15 {dimension_numbers = #tpu.dot_dimension_numbers<[1], [0], [0], [1], [0, 0, 1, 1], [], []>} : vector<128x128xbf16>, vector<128x128xbf16>, vector<128x128xf32> -> vector<128x128xf32>
    %c4 = arith.constant 4 : index
    %c0_16 = arith.constant 0 : index
    %25 = vector.load %arg6[%c4, %c0_16] : memref<8x256xf32, #tpu.memory_space<vmem>>, vector<1x128xf32>
    %26 = vector.broadcast %25 : vector<1x128xf32> to vector<128x128xf32>
    %27 = arith.mulf %24, %26 : vector<128x128xf32>
    %c5 = arith.constant 5 : index
    %c0_17 = arith.constant 0 : index
    %28 = vector.load %arg6[%c5, %c0_17] : memref<8x256xf32, #tpu.memory_space<vmem>>, vector<1x128xf32>
    %29 = vector.broadcast %28 : vector<1x128xf32> to vector<128x128xf32>
    %30 = arith.addf %27, %29 : vector<128x128xf32>
    %cst_18 = arith.constant 0.000000e+00 : f32
    %31 = vector.broadcast %cst_18 : f32 to vector<128x128xf32>
    %32 = arith.maximumf %30, %31 : vector<128x128xf32>
    %33 = arith.truncf %32 : vector<128x128xf32> to vector<128x128xbf16>
    %c0_19 = arith.constant 0 : index
    %c0_20 = arith.constant 0 : index
    %34 = vector.load %arg5[%c0_19, %c0_20] : memref<128x128xbf16, #tpu.memory_space<vmem>>, vector<128x128xbf16>
    %cst_21 = arith.constant dense<0.000000e+00> : vector<128x128xf32>
    %35 = tpu.matmul %33, %34, %cst_21 {dimension_numbers = #tpu.dot_dimension_numbers<[1], [0], [0], [1], [0, 0, 1, 1], [], []>} : vector<128x128xbf16>, vector<128x128xbf16>, vector<128x128xf32> -> vector<128x128xf32>
    %c6 = arith.constant 6 : index
    %c0_22 = arith.constant 0 : index
    %36 = vector.load %arg6[%c6, %c0_22] : memref<8x256xf32, #tpu.memory_space<vmem>>, vector<1x128xf32>
    %37 = vector.broadcast %36 : vector<1x128xf32> to vector<128x128xf32>
    %38 = arith.addf %35, %37 : vector<128x128xf32>
    %c0_23 = arith.constant 0 : index
    %c0_24 = arith.constant 0 : index
    %39 = vector.load %arg7[%c0_23, %c0_24] : memref<128x128xf32, #tpu.memory_space<vmem>>, vector<128x128xf32>
    tpu.vector_store %arg7[%c0_23, %c0_24], %38 {strides = array<i32>} : memref<128x128xf32, #tpu.memory_space<vmem>>, vector<128x128xf32>,
    return
  }
  func.func @transform_0(%arg0: i32) -> (i32, i32) {
    %c0_i32 = arith.constant 0 : i32
    %c0_i32_0 = arith.constant 0 : i32
    return %arg0, %c0_i32 : i32, i32
  }
  func.func @transform_1(%arg0: i32) -> (i32, i32) {
    %c0_i32 = arith.constant 0 : i32
    %c0_i32_0 = arith.constant 0 : i32
    %c0_i32_1 = arith.constant 0 : i32
    return %c0_i32, %c0_i32_0 : i32, i32
  }
  func.func @transform_2(%arg0: i32) -> (i32, i32) {
    %c0_i32 = arith.constant 0 : i32
    %c0_i32_0 = arith.constant 0 : i32
    %c0_i32_1 = arith.constant 0 : i32
    return %c0_i32, %c0_i32_0 : i32, i32
  }
  func.func @transform_3(%arg0: i32) -> (i32, i32) {
    %c0_i32 = arith.constant 0 : i32
    %c0_i32_0 = arith.constant 0 : i32
    %c0_i32_1 = arith.constant 0 : i32
    return %c0_i32, %c0_i32_0 : i32, i32
  }
  func.func @transform_4(%arg0: i32) -> (i32, i32) {
    %c0_i32 = arith.constant 0 : i32
    %c0_i32_0 = arith.constant 0 : i32
    %c0_i32_1 = arith.constant 0 : i32
    return %c0_i32, %c0_i32_0 : i32, i32
  }
  func.func @transform_5(%arg0: i32) -> (i32, i32) {
    %c0_i32 = arith.constant 0 : i32
    %c0_i32_0 = arith.constant 0 : i32
    %c0_i32_1 = arith.constant 0 : i32
    return %c0_i32, %c0_i32_0 : i32, i32
  }
  func.func @transform_6(%arg0: i32) -> (i32, i32) {
    %c0_i32 = arith.constant 0 : i32
    %c0_i32_0 = arith.constant 0 : i32
    return %arg0, %c0_i32 : i32, i32
  }
}

</mosaic_0001>

<bundles_post_ra>
// kernel: tpu_custom_call.1
= control target key start
LH: loop header
LB: loop body
LE: loop exit
PB: predicated region body
PF: predicated region fallthrough
CT: control target
= control target key end

     0   :  { %11 = vsyncpa [#allocation3], 0  ;;  %s2403_s0 = inlined_call_operand.vmem [shape: bf16[256,32], index: 0, kind: input, shape index: {}]   ;;  %s2404_s1 = inlined_call_operand.vmem [shape: bf16[32,256], index: 1, kind: input, shape index: {}]   ;;  %s2405_s2 = inlined_call_operand.vmem [shape: bf16[256,128], index: 2, kind: input, shape index: {}]   ;;  %s2406_s3 = inlined_call_operand.hbm [shape: bf16[128,128], index: 3, kind: input, shape index: {}]   ;;  %s2407_s4 = inlined_call_operand.hbm [shape: bf16[128,128], index: 4, kind: input, shape index: {}]   ;;  %s2408_s5 = inlined_call_operand.vmem [shape: f32[8,256], index: 5, kind: input, shape index: {}]   ;;  %s2409_s6 = inlined_call_operand.hbm [shape: f32[256,128], index: 6, kind: output, shape index: {}]  }
   0x1   :  { %12 = vsyncpa [#allocation6], 0 }
   0x2   :  { %13 = vsyncpa [#allocation4], 0 }
   0x3   :  { %15 = vsyncpa [#allocation4 + $0x1], 0  ;;  %s1945_s21 = smov 0   ;;  %s1947_s22 = smov 0  }
   0x4   :  { %s1949_s23 = smov 0   ;;  %s1951_s24 = smov 0  }
   0x5 LB: > { %s1966_s25 = sadd.s32 4294967295, %s1900_s24   ;;  %s1417_s26 = sadd.s32 4294967294, %s1900_s24   ;;  %s1900_s24 = sphi %s1951_s24, %s2427_s24   ;;  %s1896_s23 = sphi %s1949_s23, %s2426_s23   ;;  %s1892_s22 = sphi %s1947_s22, %s2425_s22   ;;  %s1888_s21 = sphi %s1945_s21, %s2424_s21  }
   0x6   : > { %s1970_s27 = sadd.s32 1, %s1900_s24   ;;  %s159_s28 = sadd.s32 1, %s1896_s23 }
   0x7   : > { %s156_s29 = ssub.s32 %s1900_s24, %s1970_s27  ;;  %p169_p0 = scmp.ne.s32.totalorder %s1896_s23, %s1892_s22 }
   0x8   : > { %p157_p1 = scmp.eq.s32.totalorder %s156_s29, 0  ;;  %p170_p2 = scmp.eq.s32.totalorder %s1966_s25, 1 }
   0x9   : > { %p175_p3 = scmp.ne.s32.totalorder %s1892_s22, %s1888_s21  ;;  %p176_p4 = scmp.eq.s32.totalorder %s1417_s26, 1 }
   0xa   : > { %s1981_s30 = scalar_select %p157_p1, %s1896_s23, %s159_s28  }
   0xb   : > { %p1983_p5 = por %p170_p2, %p169_p0  ;;  %p1987_p6 = por %p176_p4, %p175_p3 }
   0xc   : > { %p1418_p7 = scmp.ge.s32.totalorder %s1900_s24, 1  ;;  %p183_p8 = scmp.lt.s32.totalorder %s1900_s24, 3 }
   0xd   : > { %s2413_s7 = scalar_select %p1983_p5, 1, 0 }
   0xe   : > { %s2414_s8 = scalar_select %p1987_p6, 1, 0 }
   0xf   : > { %p2410_p9 = scmp.eq.s32.totalorder %s1966_s25, 0  ;;  %p1994_p10 = pnand %p1418_p7, %p183_p8 }
  0x10   : > { %s1902_s10 = smov [#allocation2]   ;;  %s1903_s13 = smov [#allocation5]  }
  0x11   : > { %s2415_s9 = scalar_select %p1994_p10, 1, 0 }
  0x12   : > { %s201_s11 = sshll.u32 %s1902_s10, 4  ;;  %p1673_p11 = pneg %p1994_p10  ;;  %s202_s11 = int_to_ptr.vmem [resolvable:$true] %s201_s11 }
  0x13   : > { %s214_s14 = sshll.u32 %s1903_s13, 4  ;;  %s1774_s17 = scalar_lea.hbm %s2406_s3, 1024  ;;  %s2006_s14 = int_to_ptr.vmem [resolvable:$true] %s214_s14 }
  0x14   : > { %p2002_p12 = pnand %p2410_p9, %p1673_p11  ;;  %p1775_p13 = scmp.ne.s32.totalorder %s2406_s3, %s1774_s17 }
  0x15   : > { %p1781_p3 = scmp.lt.u32.totalorder %s1774_s17, %s2406_s3 }
  0x16   : > { %p1776_p0 = pneg %p2002_p12 }
  0x18   : > { %p1777_p1 = pnand %p1776_p0, %p1775_p13 }
  0x1a   : > { %p1778_p2 = pneg %p1777_p1 }
  0x1c   : > { %p1783_p4 = pnand %p1781_p3, %p1778_p2 }
  0x1e   : > { %1786 = shalt.err (!%p1783_p4)
}
  0x1f   : > { %s1787_s28 = scalar_lea.vmem %s202_s11, 1024  ;;  %p1795_p9 = scmp.lt.s32.totalorder %s202_s11, %s202_s11 }
  0x20   : > { %p1788_p7 = scmp.ne.s32.totalorder %s202_s11, %s1787_s28  ;;  %p1796_p6 = scmp.lt.s32.totalorder %s1787_s28, %s1787_s28 }
  0x22   : > { %p1790_p8 = pnand %p1788_p7, %p1776_p0  ;;  %p1797_p5 = por %p1796_p6, %p1795_p9 }
  0x24   : > { %p1791_p11 = pneg %p1790_p8 }
  0x26   : > { %p1798_p10 = pnand %p1797_p5, %p1791_p11 }
  0x28   : > { %1801 = shalt.err (!%p1798_p10)
}
  0x29   : > { %s1904_s29 = smov 64   ;;  %s1905_s10 = smov 4  }
  0x2a   : > { %1676 = dma.hbm_to_vmem [thread:$0]  (!%p2002_p12), %s2406_s3, 1024, %s202_s11, [#allocation3], %s1904_s29, %s1904_s29, %s1905_s10  }
  0x2b   : > { %s1802_s18 = scalar_lea.hbm %s2407_s4, 1024 }
  0x2c   : > { %p1803_p13 = scmp.ne.s32.totalorder %s2407_s4, %s1802_s18  ;;  %p1809_p9 = scmp.lt.u32.totalorder %s1802_s18, %s2407_s4 }
  0x2e   : > { %p1805_p5 = pnand %p1803_p13, %p1776_p0 }
  0x30   : > { %p1806_p6 = pneg %p1805_p5 }
  0x32   : > { %p1811_p10 = pnand %p1809_p9, %p1806_p6 }
  0x34   : > { %1814 = shalt.err (!%p1811_p10)
}
  0x35   : > { %s1815_s11 = scalar_lea.vmem %s2006_s14, 1024  ;;  %p1823_p4 = scmp.lt.s32.totalorder %s2006_s14, %s2006_s14 }
  0x36   : > { %p1816_p1 = scmp.ne.s32.totalorder %s2006_s14, %s1815_s11  ;;  %p1824_p7 = scmp.lt.s32.totalorder %s1815_s11, %s1815_s11 }
  0x38   : > { %p1818_p2 = pnand %p1816_p1, %p1776_p0  ;;  %p1825_p8 = por %p1824_p7, %p1823_p4 }
  0x3a   : > { %p1819_p3 = pneg %p1818_p2 }
  0x3c   : > { %p1826_p11 = pnand %p1825_p8, %p1819_p3 }
  0x3e   : > { %1829 = shalt.err (!%p1826_p11)
}
  0x3f   : > { %1679 = dma.hbm_to_vmem [thread:$0]  (!%p2002_p12), %s2407_s4, 1024, %s2006_s14, [#allocation6], %s1904_s29, %s1904_s29, %s1905_s10  }
  0x40   : > { %p2417_p13 = scmp.ne.s32.totalorder %s2415_s9, 0 }
  0x41   : > { %p2418_p5 = scmp.eq.s32.totalorder (!%p2417_p13), %s1966_s25, 0 }
  0x42   : > { %242 = sbr.rel (%p2417_p13) target bundleno = 1048 (0x418), region = 44 }
  0x49   : > { %1875 = dma.done.wait (%p2418_p5), [#allocation3], 1024   ;;  %p2419_p0 = pmov %p2418_p5 }
  0x4b   : > { %1877 = vsyncadd (%p2419_p0), [#allocation3], 4294966272  ;;  %p2420_p6 = pmov %p2419_p0 }
  0x4c   : > { %p2421_p9 = pmov %p2419_p0 }
  0x4d   : > { %1879 = dma.done.wait (%p2420_p6), [#allocation6], 1024  }
  0x4e   : > { %1881 = vsyncadd (%p2421_p9), [#allocation6], 4294966272  ;;  %s1426_s12 = sshll.u32 %s1966_s25, 4  ;;  %v1906_v0 = vmov 0   ;;  %v1728_v1 = vld [vmem:[%s2404_s1 + $0x4] ss:$8 sps:$4 sm:$0xff]   ;;  %v504_v32 = vlaneseq }
  0x4f   : > { %421 = vmatprep.mubr.bf16.mxu0 %v1906_v0  ;;  %p277_p12 = scmp.lt.s32.totalorder %s1426_s12, 31  ;;  %v1730_v2 = vld [vmem:[%s2404_s1] ss:$8 sps:$4 sm:$0xff]   ;;  %389 = vmatprep.subr.bf16.mxu0 %v1728_v1  ;;  %v1731_v3 = vld [vmem:[%s2404_s1 + $0x14] ss:$8 sps:$4 sm:$0xff]   ;;  %vm364_vm0 = vcmask 261120  }
  0x50   : > { %390 = vmatpush1.bf16.msra.mxu0 %v1730_v2  ;;  %v1733_v4 = vld [vmem:[%s2404_s1 + $0x10] ss:$8 sps:$4 sm:$0xff]   ;;  %v1742_v6 = vld [vmem:[%s2405_s2 + $0x40] sm:$0xff]   ;;  %v1744_v9 = vld [vmem:[%s2405_s2 + $0x48] sm:$0xff]   ;;  %v505_v33 = vshrl.u32 %v504_v32, 7  ;;  %s273_s13 = sand.u32 1, %s1892_s22  }
  0x51   : > { %s2429_s12 = smov (!%p277_p12, %s1426_s12), 31  ;;  %391 = vmatprep.subr.bf16.mxu0 %v1731_v3  ;;  %v1743_v8 = vld [vmem:[%s2405_s2] sm:$0xff]   ;;  %1487 = vmatprep.subr.bf16.mxu1 %v1742_v6  ;;  %v1745_v10 = vld [vmem:[%s2405_s2 + $0x8] sm:$0xff]   ;;  %v1746_v11 = vld [vmem:[%s2405_s2 + $0x50] sm:$0xff]   ;;  %s1425_s15 = sshll.u32 %s273_s13, 7 }
  0x52   : > { %s1427_s9 = sshll.u32 %s2429_s12, 2  ;;  %1488 = vmatpush3.bf16.msra.mxu1 %v1743_v8  ;;  %v1747_v12 = vld [vmem:[%s2405_s2 + $0x10] sm:$0xff]   ;;  %v1748_v13 = vld [vmem:[%s2405_s2 + $0x58] sm:$0xff]   ;;  %v1750_v16 = vld [vmem:[%s2405_s2 + $0x60] sm:$0xff]   ;;  %v506_v34 = vsub.s32 0, %v505_v33  ;;  %v510_v36 = vsub.s32 1, %v505_v33 }
  0x53   : > { %s2075_s19 = scalar_lea.vmem %s2403_s0, %s1427_s9  ;;  %1489 = vmatprep.subr.bf16.mxu1 %v1744_v9  ;;  %v1749_v15 = vld [vmem:[%s2405_s2 + $0x18] sm:$0xff]   ;;  %v1751_v17 = vld [vmem:[%s2405_s2 + $0x20] sm:$0xff]   ;;  %v1752_v23 = vld [vmem:[%s2405_s2 + $0x68] sm:$0xff]   ;;  %s2333_s14 = scalar_lea.vmem [#allocation7], %s1425_s15 }
  0x54   : > { %v1734_v5 = vld [vmem:[%s2075_s19] sm:$0xff]   ;;  %392 = vmatpush1.bf16.msra.mxu0 %v1733_v4  ;;  %v1735_v7 = vld [vmem:[%s2075_s19 + $0x8] sm:$0xff]   ;;  %v1736_v14 = vld [vmem:[%s2075_s19 + $0x10] sm:$0xff]   ;;  %s1486_s29 = sshll.u32 %s1966_s25, 11  ;;  %s1333_s10 = sshll.u32 %s2333_s14, 4  ;;  %s2355_s10 = int_to_ptr.vmem [resolvable:$true] %s1333_s10 }
  0x55   : > { %v1737_v18 = vld [vmem:[%s2075_s19 + $0x18] sm:$0xff]   ;;  %v1738_v19 = vld [vmem:[%s2075_s19 + $0x20] sm:$0xff]   ;;  %v1739_v20 = vld [vmem:[%s2075_s19 + $0x28] sm:$0xff]   ;;  %s2353_s18 = scalar_lea.hbm %s2409_s6, %s1486_s29  ;;  %s2362_s25 = scalar_lea.sflag [#allocation4], %s273_s13 }
  0x56   : > { %1490 = vmatpush3.bf16.msra.mxu1 %v1745_v10  ;;  %v1740_v21 = vld [vmem:[%s2075_s19 + $0x30] sm:$0xff]   ;;  %v1741_v22 = vld [vmem:[%s2075_s19 + $0x38] sm:$0xff]   ;;  %v1753_v24 = vld [vmem:[%s2405_s2 + $0x28] sm:$0xff]   ;;  %s1830_s20 = scalar_lea.vmem %s2355_s10, 2048  ;;  %p2422_p1 = scmp.ne.s32.totalorder %s2413_s7, 0 }
  0x57   : > { %1440 = vmatmul.mubr.msk.bf16.vlgmr.msra.gmra.mrb[0].mxu0 %vm364_vm0, %v1734_v5  ;;  %1491 = vmatprep.subr.bf16.mxu1 %v1746_v11  ;;  %v1754_v25 = vld [vmem:[%s2405_s2 + $0x70] sm:$0xff]   ;;  %v1756_v27 = vld [vmem:[%s2405_s2 + $0x78] sm:$0xff]   ;;  %v1758_v29 = vld [vmem:[#allocation2] sm:$0xff]   ;;  %p1831_p10 = scmp.ne.s32.totalorder %s2355_s10, %s1830_s20  ;;  %s1907_s26 = smov [#allocation7]  }
  0x58   : > { %431 = vmatprep.mubr.bf16.mxu0 %v1906_v0  ;;  %v1755_v26 = vld [vmem:[%s2405_s2 + $0x30] sm:$0xff]   ;;  %v1757_v28 = vld [vmem:[%s2405_s2 + $0x38] sm:$0xff]   ;;  %v1759_v30 = vld [vmem:[#allocation2 + $0x8] sm:$0xff]   ;;  %1583 = vmatprep.subr.bf16.mxu0 %v1758_v29  ;;  %s1834_s28 = sshll.u32 %s1907_s26, 4  ;;  %s1835_s28 = int_to_ptr.vmem [resolvable:$false] %s1834_s28 }
  0x59   : > { %1584 = vmatpush3.bf16.msra.mxu0 %v1758_v29  ;;  %v1760_v31 = vld [vmem:[#allocation2 + $0x10] sm:$0xff]   ;;  %v502_v35 = vld [vmem:[%s2408_s5] ss:$8 sm:$0x3]  ;;  %p1832_p2 = pnand %p1831_p10, %p2422_p1  ;;  %s1836_s11 = scalar_lea.vmem %s1835_s28, 4096 }
  0x5a   : > { %1492 = vmatpush3.bf16.msra.mxu1 %v1747_v12  ;;  %1585 = vmatprep.subr.bf16.mxu0 %v1759_v30  ;;  %v1448_v37 = vld [vmem:[%s2408_s5 + $0x1] ss:$8 sm:$0x3]  ;;  %v2153_v38 = vrot.slane %v502_v35, %v506_v34  ;;  %v2155_v39 = vrot.slane %v502_v35, %v510_v36  ;;  %p1837_p4 = scmp.lt.s32.totalorder %s2355_s10, %s1835_s28  ;;  %p1838_p7 = scmp.lt.s32.totalorder %s1836_s11, %s1830_s20 }
  0x5b   : > { %1493 = vmatprep.subr.bf16.mxu1 %v1748_v13  ;;  %v2157_v40 = vrot.slane %v1448_v37, %v506_v34  ;;  %v2159_v42 = vrot.slane %v1448_v37, %v510_v36  ;;  %p1833_p3 = pneg %p1832_p2 }
  0x5c   : > { %p1839_p8 = por %p1838_p7, %p1837_p4 }
  0x5d   : > { %1586 = vmatpush3.bf16.msra.mxu0 %v1759_v30 }
  0x5e   : > { %1494 = vmatpush3.bf16.msra.mxu1 %v1749_v15  ;;  %1587 = vmatprep.subr.bf16.mxu0 %v1760_v31  ;;  %p1840_p11 = pnand %p1839_p8, %p1833_p3 }
  0x5f   : > { %1441 = vmatmul.mubr.msk.bf16.gmra.mrb[4].mxu0 %vm364_vm0, %v1735_v7  ;;  %1495 = vmatprep.subr.bf16.mxu1 %v1750_v16 }
  0x60   : > { %441 = vmatprep.mubr.bf16.mxu0 %v1906_v0 }
  0x61   : > { %1588 = vmatpush3.bf16.msra.mxu0 %v1760_v31 }
  0x62   : > { %1496 = vmatpush3.bf16.msra.mxu1 %v1751_v17 }
  0x63   : > { %1497 = vmatprep.subr.bf16.mxu1 %v1752_v23 }
  0x66   : > { %1498 = vmatpush3.bf16.msra.mxu1 %v1753_v24 }
  0x67   : > { %1442 = vmatmul.mubr.msk.bf16.gmra.mrb[8].mxu0 %vm364_vm0, %v1736_v14  ;;  %1499 = vmatprep.subr.bf16.mxu1 %v1754_v25 }
  0x68   : > { %451 = vmatprep.mubr.bf16.mxu0 %v1906_v0 }
  0x6a   : > { %1500 = vmatpush3.bf16.msra.mxu1 %v1755_v26 }
  0x6b   : > { %1501 = vmatprep.subr.bf16.mxu1 %v1756_v27 }
  0x6e   : > { %1502 = vmatpush3.bf16.msra.mxu1 %v1757_v28 }
  0x6f   : > { %1443 = vmatmul.mubr.msk.bf16.gmra.mrb[12].mxu0 %vm364_vm0, %v1737_v18 }
  0x70   : > { %461 = vmatprep.mubr.bf16.mxu0 %v1906_v0 }
  0x77   : > { %1444 = vmatmul.mubr.msk.bf16.gmra.mrb[16].mxu0 %vm364_vm0, %v1738_v19 }
  0x78   : > { %471 = vmatprep.mubr.bf16.mxu0 %v1906_v0 }
  0x7f   : > { %1445 = vmatmul.mubr.msk.bf16.gmra.mrb[20].mxu0 %vm364_vm0, %v1739_v20 }
  0x80   : > { %481 = vmatprep.mubr.bf16.mxu0 %v1906_v0 }
  0x87   : > { %1446 = vmatmul.mubr.msk.bf16.gmra.mrb[24].mxu0 %vm364_vm0, %v1740_v21 }
  0x88   : > { %491 = vmatprep.mubr.bf16.mxu0 %v1906_v0 }
  0x8f   : > { %1447 = vmatmul.mubr.msk.bf16.gmra.mrb[28].mxu0 %vm364_vm0, %v1741_v22 }
 0x12a   : > { %v423_v41 = vpop.f32.mrb[0].mxu0 }
 0x12b   : > { %v514_v43 = vmul.f32 %v2153_v38, %v423_v41  ;;  %v425_v44 = vpop.f32.mrb[1].mxu0 }
 0x12c   : > { %v515_v45 = vmul.f32 %v2155_v39, %v425_v44  ;;  %v427_v46 = vpop.f32.mrb[2].mxu0 }
 0x12d   : > { %v559_v47 = vadd.f32 %v2157_v40, %v514_v43  ;;  %v516_v48 = vmul.f32 %v2153_v38, %v427_v46  ;;  %v429_v49 = vpop.f32.mrb[3].mxu0 }
 0x12e   : > { %v517_v50 = vmul.f32 %v2155_v39, %v429_v49  ;;  %v560_v51 = vadd.f32 %v2159_v42, %v515_v45 }
 0x12f   : > { %v561_v52 = vadd.f32 %v2157_v40, %v516_v48  ;;  %v591_v54 = vmax.f32 %v559_v47, 0.0 }
 0x130   : > { %v562_v53 = vadd.f32 %v2159_v42, %v517_v50  ;;  %v592_v57 = vmax.f32 %v560_v51, 0.0 }
 0x131   : > { %v593_v55 = vmax.f32 %v561_v52, 0.0 }
 0x132   : > { %v433_v56 = vpop.f32.mrb[4].mxu0  ;;  %v594_v58 = vmax.f32 %v562_v53, 0.0 }
 0x133   : > { %v518_v59 = vmul.f32 %v2153_v38, %v433_v56  ;;  %v435_v60 = vpop.f32.mrb[5].mxu0  ;;  %v623_v61 = vpack.c.bf16 %v593_v55, %v591_v54 }
 0x134   : > { %v519_v62 = vmul.f32 %v2155_v39, %v435_v60  ;;  %v437_v63 = vpop.f32.mrb[6].mxu0  ;;  %v624_v0 = vpack.c.bf16 %v594_v58, %v592_v57 }
 0x135   : > { %v563_v1 = vadd.f32 %v2157_v40, %v518_v59  ;;  %v520_v2 = vmul.f32 %v2153_v38, %v437_v63  ;;  %v439_v3 = vpop.f32.mrb[7].mxu0 }
 0x136   : > { %v564_v4 = vadd.f32 %v2159_v42, %v519_v62  ;;  %v521_v5 = vmul.f32 %v2155_v39, %v439_v3  ;;  %799 = vmatprep.mubr.bf16.mxu1 %v624_v0 }
 0x137   : > { %v565_v6 = vadd.f32 %v2157_v40, %v520_v2  ;;  %800 = vmatmul.mubr.bf16.vlgmr.msra.gmra.mrb[0].mxu1 %v623_v61  ;;  %v595_v8 = vmax.f32 %v563_v1, 0.0 }
 0x138   : > { %v566_v7 = vadd.f32 %v2159_v42, %v521_v5  ;;  %v596_v10 = vmax.f32 %v564_v4, 0.0 }
 0x139   : > { %v597_v9 = vmax.f32 %v565_v6, 0.0 }
 0x13a   : > { %v598_v11 = vmax.f32 %v566_v7, 0.0  ;;  %v443_v12 = vpop.f32.mrb[8].mxu0 }
 0x13b   : > { %v522_v13 = vmul.f32 %v2153_v38, %v443_v12  ;;  %v445_v14 = vpop.f32.mrb[9].mxu0  ;;  %v625_v15 = vpack.c.bf16 %v597_v9, %v595_v8 }
 0x13c   : > { %v523_v16 = vmul.f32 %v2155_v39, %v445_v14  ;;  %v447_v17 = vpop.f32.mrb[10].mxu0  ;;  %v626_v18 = vpack.c.bf16 %v598_v11, %v596_v10 }
 0x13d   : > { %v567_v19 = vadd.f32 %v2157_v40, %v522_v13  ;;  %v524_v20 = vmul.f32 %v2153_v38, %v447_v17  ;;  %v449_v21 = vpop.f32.mrb[11].mxu0 }
 0x13e   : > { %v568_v22 = vadd.f32 %v2159_v42, %v523_v16  ;;  %v525_v23 = vmul.f32 %v2155_v39, %v449_v21  ;;  %807 = vmatprep.mubr.bf16.mxu1 %v626_v18 }
 0x13f   : > { %v569_v24 = vadd.f32 %v2157_v40, %v524_v20  ;;  %808 = vmatmul.mubr.bf16.gmra.mrb[4].mxu1 %v625_v15  ;;  %v599_v26 = vmax.f32 %v567_v19, 0.0 }
 0x140   : > { %v570_v25 = vadd.f32 %v2159_v42, %v525_v23  ;;  %v600_v28 = vmax.f32 %v568_v22, 0.0 }
 0x141   : > { %v601_v27 = vmax.f32 %v569_v24, 0.0 }
 0x142   : > { %v602_v29 = vmax.f32 %v570_v25, 0.0  ;;  %v453_v30 = vpop.f32.mrb[12].mxu0 }
 0x143   : > { %v526_v31 = vmul.f32 %v2153_v38, %v453_v30  ;;  %v455_v32 = vpop.f32.mrb[13].mxu0  ;;  %v627_v33 = vpack.c.bf16 %v601_v27, %v599_v26 }
 0x144   : > { %v527_v34 = vmul.f32 %v2155_v39, %v455_v32  ;;  %v457_v35 = vpop.f32.mrb[14].mxu0  ;;  %v628_v36 = vpack.c.bf16 %v602_v29, %v600_v28 }
 0x145   : > { %v571_v37 = vadd.f32 %v2157_v40, %v526_v31  ;;  %v528_v41 = vmul.f32 %v2153_v38, %v457_v35  ;;  %v459_v43 = vpop.f32.mrb[15].mxu0 }
 0x146   : > { %v572_v44 = vadd.f32 %v2159_v42, %v527_v34  ;;  %v529_v45 = vmul.f32 %v2155_v39, %v459_v43  ;;  %815 = vmatprep.mubr.bf16.mxu1 %v628_v36 }
 0x147   : > { %v573_v46 = vadd.f32 %v2157_v40, %v528_v41  ;;  %816 = vmatmul.mubr.bf16.gmra.mrb[8].mxu1 %v627_v33  ;;  %v603_v48 = vmax.f32 %v571_v37, 0.0 }
 0x148   : > { %v574_v47 = vadd.f32 %v2159_v42, %v529_v45  ;;  %v604_v50 = vmax.f32 %v572_v44, 0.0 }
 0x149   : > { %v605_v49 = vmax.f32 %v573_v46, 0.0 }
 0x14a   : > { %v606_v51 = vmax.f32 %v574_v47, 0.0  ;;  %v463_v52 = vpop.f32.mrb[16].mxu0 }
 0x14b   : > { %v530_v53 = vmul.f32 %v2153_v38, %v463_v52  ;;  %v465_v54 = vpop.f32.mrb[17].mxu0  ;;  %v629_v55 = vpack.c.bf16 %v605_v49, %v603_v48 }
 0x14c   : > { %v531_v56 = vmul.f32 %v2155_v39, %v465_v54  ;;  %v467_v57 = vpop.f32.mrb[18].mxu0  ;;  %v630_v58 = vpack.c.bf16 %v606_v51, %v604_v50 }
 0x14d   : > { %v575_v59 = vadd.f32 %v2157_v40, %v530_v53  ;;  %v532_v60 = vmul.f32 %v2153_v38, %v467_v57  ;;  %v469_v61 = vpop.f32.mrb[19].mxu0 }
 0x14e   : > { %v576_v62 = vadd.f32 %v2159_v42, %v531_v56  ;;  %v533_v63 = vmul.f32 %v2155_v39, %v469_v61  ;;  %823 = vmatprep.mubr.bf16.mxu1 %v630_v58 }
 0x14f   : > { %v577_v0 = vadd.f32 %v2157_v40, %v532_v60  ;;  %824 = vmatmul.mubr.bf16.gmra.mrb[12].mxu1 %v629_v55  ;;  %v607_v2 = vmax.f32 %v575_v59, 0.0 }
 0x150   : > { %v578_v1 = vadd.f32 %v2159_v42, %v533_v63  ;;  %v608_v4 = vmax.f32 %v576_v62, 0.0 }
 0x151   : > { %v609_v3 = vmax.f32 %v577_v0, 0.0 }
 0x152   : > { %v610_v5 = vmax.f32 %v578_v1, 0.0  ;;  %v473_v6 = vpop.f32.mrb[20].mxu0 }
 0x153   : > { %v534_v7 = vmul.f32 %v2153_v38, %v473_v6  ;;  %v475_v8 = vpop.f32.mrb[21].mxu0  ;;  %v631_v9 = vpack.c.bf16 %v609_v3, %v607_v2  ;;  %v1762_v2 = vld [vmem:[#allocation2 + $0x20] sm:$0xff]   ;;  %v2228_v6 = vld [vmem:[#allocation5 + $0x18] sm:$0xff]  }
 0x154   : > { %v535_v10 = vmul.f32 %v2155_v39, %v475_v8  ;;  %v477_v11 = vpop.f32.mrb[22].mxu0  ;;  %v632_v12 = vpack.c.bf16 %v610_v5, %v608_v4  ;;  %v1766_v3 = vld [vmem:[#allocation5] sm:$0xff]   ;;  %v1767_v4 = vld [vmem:[#allocation5 + $0x8] sm:$0xff]   ;;  %v2225_v5 = vld [vmem:[#allocation5 + $0x10] sm:$0xff]  }
 0x155   : > { %v579_v13 = vadd.f32 %v2157_v40, %v534_v7  ;;  %v536_v14 = vmul.f32 %v2153_v38, %v477_v11  ;;  %v479_v15 = vpop.f32.mrb[23].mxu0  ;;  %1647 = vmatprep.subr.bf16.mxu1 %v1766_v3  ;;  %v2232_v7 = vld [vmem:[#allocation5 + $0x20] sm:$0xff]  }
 0x156   : > { %v580_v16 = vadd.f32 %v2159_v42, %v535_v10  ;;  %v537_v17 = vmul.f32 %v2155_v39, %v479_v15  ;;  %831 = vmatprep.mubr.bf16.mxu1 %v632_v12  ;;  %1655 = vmatpush3.bf16.msra.mxu1 %v1766_v3  ;;  %v2240_v10 = vld [vmem:[%s2408_s5 + $0x2] ss:$0 sm:$0xff] }
 0x157   : > { %v581_v18 = vadd.f32 %v2157_v40, %v536_v14  ;;  %832 = vmatmul.mubr.bf16.gmra.mrb[16].mxu1 %v631_v9  ;;  %v611_v20 = vmax.f32 %v579_v13, 0.0  ;;  %1648 = vmatprep.subr.bf16.mxu1 %v1767_v4  ;;  %v2245_v13 = vld [vmem:[%s2408_s5 + $0x3] ss:$0 sm:$0xff] }
 0x158   : > { %v582_v19 = vadd.f32 %v2159_v42, %v537_v17  ;;  %v612_v22 = vmax.f32 %v580_v16, 0.0 }
 0x159   : > { %v613_v21 = vmax.f32 %v581_v18, 0.0 }
 0x15a   : > { %v614_v23 = vmax.f32 %v582_v19, 0.0  ;;  %v483_v24 = vpop.f32.mrb[24].mxu0  ;;  %1656 = vmatpush3.bf16.msra.mxu1 %v1767_v4 }
 0x15b   : > { %v538_v25 = vmul.f32 %v2153_v38, %v483_v24  ;;  %v485_v26 = vpop.f32.mrb[25].mxu0  ;;  %v633_v27 = vpack.c.bf16 %v613_v21, %v611_v20  ;;  %1649 = vmatprep.subr.bf16.mxu1 %v2225_v5 }
 0x15c   : > { %v539_v28 = vmul.f32 %v2155_v39, %v485_v26  ;;  %v487_v29 = vpop.f32.mrb[26].mxu0  ;;  %v634_v30 = vpack.c.bf16 %v614_v23, %v612_v22 }
 0x15d   : > { %v583_v31 = vadd.f32 %v2157_v40, %v538_v25  ;;  %v540_v32 = vmul.f32 %v2153_v38, %v487_v29  ;;  %v489_v33 = vpop.f32.mrb[27].mxu0 }
 0x15e   : > { %v584_v34 = vadd.f32 %v2159_v42, %v539_v28  ;;  %v541_v35 = vmul.f32 %v2155_v39, %v489_v33  ;;  %839 = vmatprep.mubr.bf16.mxu1 %v634_v30  ;;  %1657 = vmatpush3.bf16.msra.mxu1 %v2225_v5 }
 0x15f   : > { %v585_v36 = vadd.f32 %v2157_v40, %v540_v32  ;;  %840 = vmatmul.mubr.bf16.gmra.mrb[20].mxu1 %v633_v27  ;;  %v615_v41 = vmax.f32 %v583_v31, 0.0  ;;  %1650 = vmatprep.subr.bf16.mxu1 %v2228_v6 }
 0x160   : > { %v586_v37 = vadd.f32 %v2159_v42, %v541_v35  ;;  %v616_v44 = vmax.f32 %v584_v34, 0.0 }
 0x161   : > { %v617_v43 = vmax.f32 %v585_v36, 0.0 }
 0x162   : > { %v618_v45 = vmax.f32 %v586_v37, 0.0  ;;  %v493_v46 = vpop.f32.mrb[28].mxu0  ;;  %1658 = vmatpush3.bf16.msra.mxu1 %v2228_v6 }
 0x163   : > { %v542_v47 = vmul.f32 %v2153_v38, %v493_v46  ;;  %v495_v48 = vpop.f32.mrb[29].mxu0  ;;  %v635_v49 = vpack.c.bf16 %v617_v43, %v615_v41  ;;  %1651 = vmatprep.subr.bf16.mxu1 %v2232_v7 }
 0x164   : > { %v543_v50 = vmul.f32 %v2155_v39, %v495_v48  ;;  %v497_v51 = vpop.f32.mrb[30].mxu0  ;;  %v636_v52 = vpack.c.bf16 %v618_v45, %v616_v44 }
 0x165   : > { %v587_v53 = vadd.f32 %v2157_v40, %v542_v47  ;;  %v544_v54 = vmul.f32 %v2153_v38, %v497_v51  ;;  %v499_v55 = vpop.f32.mrb[31].mxu0  ;;  %v1761_v38 = vld [vmem:[#allocation2 + $0x18] sm:$0xff]  }
 0x166   : > { %v588_v56 = vadd.f32 %v2159_v42, %v543_v50  ;;  %v545_v57 = vmul.f32 %v2155_v39, %v499_v55  ;;  %847 = vmatprep.mubr.bf16.mxu1 %v636_v52  ;;  %1589 = vmatprep.subr.bf16.mxu0 %v1761_v38  ;;  %v1763_v39 = vld [vmem:[#allocation2 + $0x28] sm:$0xff]  }
 0x167   : > { %v589_v58 = vadd.f32 %v2157_v40, %v544_v54  ;;  %848 = vmatmul.mubr.bf16.gmra.mrb[24].mxu1 %v635_v49  ;;  %v619_v60 = vmax.f32 %v587_v53, 0.0  ;;  %1590 = vmatpush3.bf16.msra.mxu0 %v1761_v38  ;;  %v1764_v40 = vld [vmem:[#allocation2 + $0x30] sm:$0xff]  }
 0x168   : > { %v590_v59 = vadd.f32 %v2159_v42, %v545_v57  ;;  %v620_v62 = vmax.f32 %v588_v56, 0.0  ;;  %1591 = vmatprep.subr.bf16.mxu0 %v1762_v2  ;;  %v1765_v42 = vld [vmem:[#allocation2 + $0x38] sm:$0xff]   ;;  %1659 = vmatpush3.bf16.msra.mxu1 %v2232_v7 }
 0x169   : > { %v621_v61 = vmax.f32 %v589_v58, 0.0 }
 0x16a   : > { %v622_v63 = vmax.f32 %v590_v59, 0.0 }
 0x16b   : > { %v637_v0 = vpack.c.bf16 %v621_v61, %v619_v60  ;;  %1592 = vmatpush3.bf16.msra.mxu0 %v1762_v2 }
 0x16c   : > { %v638_v1 = vpack.c.bf16 %v622_v63, %v620_v62  ;;  %1593 = vmatprep.subr.bf16.mxu0 %v1763_v39 }
 0x16e   : > { %855 = vmatprep.mubr.bf16.mxu1 %v638_v1 }
 0x16f   : > { %856 = vmatmul.mubr.bf16.gmra.mrb[28].mxu1 %v637_v0  ;;  %1594 = vmatpush3.bf16.msra.mxu0 %v1763_v39 }
 0x170   : > { %1595 = vmatprep.subr.bf16.mxu0 %v1764_v40 }
 0x173   : > { %1596 = vmatpush3.bf16.msra.mxu0 %v1764_v40 }
 0x174   : > { %1597 = vmatprep.subr.bf16.mxu0 %v1765_v42 }
 0x177   : > { %1598 = vmatpush3.bf16.msra.mxu0 %v1765_v42 }
 0x178   : > { %1615 = vmatprep.subr.bf16.mxu0 %v1766_v3 }
 0x20a   : > { %v1503_v8 = vpop.f32.mrb[0].mxu1 }
 0x20b   : > { %v1504_v9 = vpop.f32.mrb[1].mxu1 }
 0x20c   : > { %v1505_v11 = vadd.f32 %v1504_v9, %v1503_v8  ;;  %v1506_v12 = vpop.f32.mrb[2].mxu1 }
 0x20d   : > { %v1507_v14 = vpop.f32.mrb[3].mxu1 }
 0x20e   : > { %v865_v15 = vmul.f32 %v1505_v11, %v2240_v10  ;;  %v1508_v16 = vadd.f32 %v1507_v14, %v1506_v12 }
 0x210   : > { %v882_v17 = vadd.f32 %v2245_v13, %v865_v15  ;;  %v866_v18 = vmul.f32 %v1508_v16, %v2240_v10 }
 0x212   : > { %v883_v19 = vadd.f32 %v2245_v13, %v866_v18  ;;  %v1509_v20 = vpop.f32.mrb[4].mxu1  ;;  %v898_v22 = vmax.f32 %v882_v17, 0.0 }
 0x213   : > { %v1510_v21 = vpop.f32.mrb[5].mxu1 }
 0x214   : > { %v899_v23 = vmax.f32 %v883_v19, 0.0  ;;  %v1511_v24 = vadd.f32 %v1510_v21, %v1509_v20  ;;  %v1512_v25 = vpop.f32.mrb[6].mxu1 }
 0x215   : > { %v1513_v26 = vpop.f32.mrb[7].mxu1 }
 0x216   : > { %v867_v27 = vmul.f32 %v1511_v24, %v2240_v10  ;;  %v1514_v28 = vadd.f32 %v1513_v26, %v1512_v25  ;;  %v914_v29 = vpack.c.bf16 %v899_v23, %v898_v22 }
 0x218   : > { %v884_v30 = vadd.f32 %v2245_v13, %v867_v27  ;;  %v868_v31 = vmul.f32 %v1514_v28, %v2240_v10  ;;  %1599 = vmatprep.mubr.bf16.mxu0 %v914_v29 }
 0x21a   : > { %v885_v32 = vadd.f32 %v2245_v13, %v868_v31  ;;  %v1515_v33 = vpop.f32.mrb[8].mxu1  ;;  %v900_v35 = vmax.f32 %v884_v30, 0.0 }
 0x21b   : > { %v1516_v34 = vpop.f32.mrb[9].mxu1 }
 0x21c   : > { %v901_v36 = vmax.f32 %v885_v32, 0.0  ;;  %v1517_v37 = vadd.f32 %v1516_v34, %v1515_v33  ;;  %v1518_v41 = vpop.f32.mrb[10].mxu1 }
 0x21d   : > { %v1519_v43 = vpop.f32.mrb[11].mxu1 }
 0x21e   : > { %v915_v44 = vpack.c.bf16 %v901_v36, %v900_v35  ;;  %v869_v45 = vmul.f32 %v1517_v37, %v2240_v10  ;;  %v1520_v46 = vadd.f32 %v1519_v43, %v1518_v41 }
 0x220   : > { %v886_v47 = vadd.f32 %v2245_v13, %v869_v45  ;;  %v870_v48 = vmul.f32 %v1520_v46, %v2240_v10  ;;  %1600 = vmatmul.mubr.bf16.vlgmr.msra.gmra.mrb[32].mxu0 %v915_v44 }
 0x221   : > { %1616 = vmatpush3.bf16.msra.mxu0 %v1766_v3 }
 0x222   : > { %v887_v49 = vadd.f32 %v2245_v13, %v870_v48  ;;  %v1521_v50 = vpop.f32.mrb[12].mxu1  ;;  %1617 = vmatprep.subr.bf16.mxu0 %v1767_v4  ;;  %v902_v52 = vmax.f32 %v886_v47, 0.0 }
 0x223   : > { %v1522_v51 = vpop.f32.mrb[13].mxu1 }
 0x224   : > { %v903_v53 = vmax.f32 %v887_v49, 0.0  ;;  %v1523_v54 = vadd.f32 %v1522_v51, %v1521_v50  ;;  %v1524_v55 = vpop.f32.mrb[14].mxu1 }
 0x225   : > { %v1525_v56 = vpop.f32.mrb[15].mxu1  ;;  %1618 = vmatpush3.bf16.msra.mxu0 %v1767_v4 }
 0x226   : > { %v871_v57 = vmul.f32 %v1523_v54, %v2240_v10  ;;  %v1526_v58 = vadd.f32 %v1525_v56, %v1524_v55  ;;  %v916_v59 = vpack.c.bf16 %v903_v53, %v902_v52  ;;  %1619 = vmatprep.subr.bf16.mxu0 %v2225_v5  ;;  %v1771_v56 = vld [vmem:[#allocation5 + $0x28] sm:$0xff]  }
 0x227   : > { %1652 = vmatprep.subr.bf16.mxu1 %v1771_v56 }
 0x228   : > { %v888_v60 = vadd.f32 %v2245_v13, %v871_v57  ;;  %v872_v61 = vmul.f32 %v1526_v58, %v2240_v10  ;;  %1603 = vmatprep.mubr.bf16.mxu0 %v916_v59  ;;  %1660 = vmatpush3.bf16.msra.mxu1 %v1771_v56  ;;  %v1772_v57 = vld [vmem:[#allocation5 + $0x30] sm:$0xff]   ;;  %v1773_v58 = vld [vmem:[#allocation5 + $0x38] sm:$0xff]   ;;  %v2293_v59 = vld [vmem:[%s2408_s5 + $0x5] ss:$0 sm:$0xff] }
 0x229   : > { %1620 = vmatpush3.bf16.msra.mxu0 %v2225_v5  ;;  %1653 = vmatprep.subr.bf16.mxu1 %v1772_v57 }
 0x22a   : > { %v889_v62 = vadd.f32 %v2245_v13, %v872_v61  ;;  %v1527_v63 = vpop.f32.mrb[16].mxu1  ;;  %1621 = vmatprep.subr.bf16.mxu0 %v2228_v6  ;;  %v904_v1 = vmax.f32 %v888_v60, 0.0 }
 0x22b   : > { %v1528_v0 = vpop.f32.mrb[17].mxu1 }
 0x22c   : > { %v905_v38 = vmax.f32 %v889_v62, 0.0  ;;  %v1529_v2 = vadd.f32 %v1528_v0, %v1527_v63  ;;  %v1530_v39 = vpop.f32.mrb[18].mxu1  ;;  %1661 = vmatpush3.bf16.msra.mxu1 %v1772_v57 }
 0x22d   : > { %v1531_v40 = vpop.f32.mrb[19].mxu1  ;;  %1622 = vmatpush3.bf16.msra.mxu0 %v2228_v6  ;;  %1654 = vmatprep.subr.bf16.mxu1 %v1773_v58 }
 0x22e   : > { %v873_v42 = vmul.f32 %v1529_v2, %v2240_v10  ;;  %v1532_v3 = vadd.f32 %v1531_v40, %v1530_v39  ;;  %v917_v4 = vpack.c.bf16 %v905_v38, %v904_v1  ;;  %1623 = vmatprep.subr.bf16.mxu0 %v2232_v7 }
 0x230   : > { %v890_v5 = vadd.f32 %v2245_v13, %v873_v42  ;;  %v874_v8 = vmul.f32 %v1532_v3, %v2240_v10  ;;  %1604 = vmatmul.mubr.bf16.gmra.mrb[36].mxu0 %v917_v4  ;;  %1662 = vmatpush3.bf16.msra.mxu1 %v1773_v58 }
 0x231   : > { %1624 = vmatpush3.bf16.msra.mxu0 %v2232_v7 }
 0x232   : > { %v891_v9 = vadd.f32 %v2245_v13, %v874_v8  ;;  %v1533_v11 = vpop.f32.mrb[20].mxu1  ;;  %v906_v14 = vmax.f32 %v890_v5, 0.0  ;;  %1625 = vmatprep.subr.bf16.mxu0 %v1771_v56 }
 0x233   : > { %v1534_v12 = vpop.f32.mrb[21].mxu1 }
 0x234   : > { %v907_v15 = vmax.f32 %v891_v9, 0.0  ;;  %v1535_v6 = vadd.f32 %v1534_v12, %v1533_v11  ;;  %v1536_v16 = vpop.f32.mrb[22].mxu1 }
 0x235   : > { %v1537_v17 = vpop.f32.mrb[23].mxu1  ;;  %1626 = vmatpush3.bf16.msra.mxu0 %v1771_v56 }
 0x236   : > { %v875_v18 = vmul.f32 %v1535_v6, %v2240_v10  ;;  %v1538_v19 = vadd.f32 %v1537_v17, %v1536_v16  ;;  %v918_v20 = vpack.c.bf16 %v907_v15, %v906_v14  ;;  %1627 = vmatprep.subr.bf16.mxu0 %v1772_v57 }
 0x238   : > { %v892_v21 = vadd.f32 %v2245_v13, %v875_v18  ;;  %v876_v22 = vmul.f32 %v1538_v19, %v2240_v10  ;;  %1607 = vmatprep.mubr.bf16.mxu0 %v918_v20 }
 0x239   : > { %1628 = vmatpush3.bf16.msra.mxu0 %v1772_v57 }
 0x23a   : > { %v893_v7 = vadd.f32 %v2245_v13, %v876_v22  ;;  %v1539_v23 = vpop.f32.mrb[24].mxu1  ;;  %v908_v25 = vmax.f32 %v892_v21, 0.0  ;;  %1629 = vmatprep.subr.bf16.mxu0 %v1773_v58 }
 0x23b   : > { %v1540_v24 = vpop.f32.mrb[25].mxu1 }
 0x23c   : > { %v909_v26 = vmax.f32 %v893_v7, 0.0  ;;  %v1541_v27 = vadd.f32 %v1540_v24, %v1539_v23  ;;  %v1542_v28 = vpop.f32.mrb[26].mxu1 }
 0x23d   : > { %v1543_v29 = vpop.f32.mrb[27].mxu1  ;;  %1630 = vmatpush3.bf16.msra.mxu0 %v1773_v58 }
 0x23e   : > { %v877_v30 = vmul.f32 %v1541_v27, %v2240_v10  ;;  %v1544_v31 = vadd.f32 %v1543_v29, %v1542_v28  ;;  %v919_v32 = vpack.c.bf16 %v909_v26, %v908_v25 }
 0x240   : > { %v894_v33 = vadd.f32 %v2245_v13, %v877_v30  ;;  %v878_v34 = vmul.f32 %v1544_v31, %v2240_v10  ;;  %1608 = vmatmul.mubr.bf16.gmra.mrb[40].mxu0 %v919_v32 }
 0x242   : > { %v895_v35 = vadd.f32 %v2245_v13, %v878_v34  ;;  %v1545_v36 = vpop.f32.mrb[28].mxu1  ;;  %v910_v41 = vmax.f32 %v894_v33, 0.0 }
 0x243   : > { %v1546_v37 = vpop.f32.mrb[29].mxu1 }
 0x244   : > { %v911_v43 = vmax.f32 %v895_v35, 0.0  ;;  %v1547_v44 = vadd.f32 %v1546_v37, %v1545_v36  ;;  %v1548_v45 = vpop.f32.mrb[30].mxu1 }
 0x245   : > { %v1549_v46 = vpop.f32.mrb[31].mxu1 }
 0x246   : > { %v879_v47 = vmul.f32 %v1547_v44, %v2240_v10  ;;  %v1550_v48 = vadd.f32 %v1549_v46, %v1548_v45  ;;  %v920_v49 = vpack.c.bf16 %v911_v43, %v910_v41 }
 0x248   : > { %v896_v50 = vadd.f32 %v2245_v13, %v879_v47  ;;  %v880_v51 = vmul.f32 %v1550_v48, %v2240_v10  ;;  %1611 = vmatprep.mubr.bf16.mxu0 %v920_v49  ;;  %v2288_v10 = vld [vmem:[%s2408_s5 + $0x4] ss:$0 sm:$0xff] }
 0x24a   : > { %v897_v52 = vadd.f32 %v2245_v13, %v880_v51  ;;  %v912_v53 = vmax.f32 %v896_v50, 0.0 }
 0x24c   : > { %v913_v54 = vmax.f32 %v897_v52, 0.0 }
 0x24e   : > { %v921_v55 = vpack.c.bf16 %v913_v54, %v912_v53 }
 0x250   : > { %1612 = vmatmul.mubr.bf16.gmra.mrb[44].mxu0 %v921_v55 }
 0x2f3   : > { %v1601_v13 = vpop.f32.mrb[32].mxu0 }
 0x2f4   : > { %v1086_v60 = vmul.f32 %v1601_v13, %v2288_v10  ;;  %v1020_v61 = vpop.f32.mrb[33].mxu0 }
 0x2f5   : > { %v1084_v62 = vmul.f32 %v2288_v10, %v1020_v61  ;;  %v1602_v63 = vpop.f32.mrb[34].mxu0 }
 0x2f6   : > { %v1103_v0 = vadd.f32 %v2293_v59, %v1086_v60  ;;  %v1087_v1 = vmul.f32 %v1602_v63, %v2288_v10  ;;  %v1023_v38 = vpop.f32.mrb[35].mxu0 }
 0x2f7   : > { %v1101_v2 = vadd.f32 %v2293_v59, %v1084_v62  ;;  %v1085_v39 = vmul.f32 %v2288_v10, %v1023_v38 }
 0x2f8   : > { %v1104_v40 = vadd.f32 %v2293_v59, %v1087_v1  ;;  %v1119_v3 = vmax.f32 %v1103_v0, 0.0 }
 0x2f9   : > { %v1102_v42 = vadd.f32 %v2293_v59, %v1085_v39  ;;  %v1117_v5 = vmax.f32 %v1101_v2, 0.0 }
 0x2fa   : > { %v1120_v4 = vmax.f32 %v1104_v40, 0.0  ;;  %v1157_v40 = vld [vmem:[%s2408_s5 + $0x6] ss:$0 sm:$0xff] }
 0x2fb   : > { %v1118_v8 = vmax.f32 %v1102_v42, 0.0 }
 0x2fc   : > { %v1134_v9 = vpack.c.bf16 %v1120_v4, %v1119_v3 }
 0x2fd   : > { %v1133_v11 = vpack.c.bf16 %v1118_v8, %v1117_v5 }
 0x2ff   : > { %1631 = vmatprep.mubr.bf16.mxu0 %v1133_v11 }
 0x300   : > { %1632 = vmatmul.mubr.bf16.vlgmr.msra.gmra.mrb[48].mxu0 %v1134_v9 }
 0x303   : > { %v1605_v12 = vpop.f32.mrb[36].mxu0 }
 0x304   : > { %v1090_v14 = vmul.f32 %v1605_v12, %v2288_v10  ;;  %v1036_v15 = vpop.f32.mrb[37].mxu0 }
 0x305   : > { %v1088_v6 = vmul.f32 %v2288_v10, %v1036_v15  ;;  %v1606_v16 = vpop.f32.mrb[38].mxu0 }
 0x306   : > { %v1107_v17 = vadd.f32 %v2293_v59, %v1090_v14  ;;  %v1091_v18 = vmul.f32 %v1606_v16, %v2288_v10  ;;  %v1039_v19 = vpop.f32.mrb[39].mxu0 }
 0x307   : > { %v1105_v20 = vadd.f32 %v2293_v59, %v1088_v6  ;;  %v1089_v21 = vmul.f32 %v2288_v10, %v1039_v19 }
 0x308   : > { %v1108_v22 = vadd.f32 %v2293_v59, %v1091_v18  ;;  %v1123_v23 = vmax.f32 %v1107_v17, 0.0 }
 0x309   : > { %v1106_v7 = vadd.f32 %v2293_v59, %v1089_v21  ;;  %v1121_v25 = vmax.f32 %v1105_v20, 0.0 }
 0x30a   : > { %v1124_v24 = vmax.f32 %v1108_v22, 0.0 }
 0x30b   : > { %v1122_v26 = vmax.f32 %v1106_v7, 0.0 }
 0x30c   : > { %v1136_v27 = vpack.c.bf16 %v1124_v24, %v1123_v23 }
 0x30d   : > { %v1135_v28 = vpack.c.bf16 %v1122_v26, %v1121_v25 }
 0x30f   : > { %1635 = vmatprep.mubr.bf16.mxu1 %v1135_v28 }
 0x310   : > { %1636 = vmatmul.mubr.bf16.vlgmr.msra.gmra.mrb[32].mxu1 %v1136_v27 }
 0x313   : > { %v1609_v29 = vpop.f32.mrb[40].mxu0 }
 0x314   : > { %v1094_v30 = vmul.f32 %v1609_v29, %v2288_v10  ;;  %v1052_v31 = vpop.f32.mrb[41].mxu0 }
 0x315   : > { %v1092_v32 = vmul.f32 %v2288_v10, %v1052_v31  ;;  %v1610_v33 = vpop.f32.mrb[42].mxu0 }
 0x316   : > { %v1111_v34 = vadd.f32 %v2293_v59, %v1094_v30  ;;  %v1095_v35 = vmul.f32 %v1610_v33, %v2288_v10  ;;  %v1055_v36 = vpop.f32.mrb[43].mxu0 }
 0x317   : > { %v1109_v37 = vadd.f32 %v2293_v59, %v1092_v32  ;;  %v1093_v41 = vmul.f32 %v2288_v10, %v1055_v36 }
 0x318   : > { %v1112_v43 = vadd.f32 %v2293_v59, %v1095_v35  ;;  %v1127_v45 = vmax.f32 %v1111_v34, 0.0 }
 0x319   : > { %v1110_v44 = vadd.f32 %v2293_v59, %v1093_v41  ;;  %v1125_v47 = vmax.f32 %v1109_v37, 0.0 }
 0x31a   : > { %v1128_v46 = vmax.f32 %v1112_v43, 0.0 }
 0x31b   : > { %v1126_v48 = vmax.f32 %v1110_v44, 0.0 }
 0x31c   : > { %v1138_v49 = vpack.c.bf16 %v1128_v46, %v1127_v45 }
 0x31d   : > { %v1137_v50 = vpack.c.bf16 %v1126_v48, %v1125_v47 }
 0x31f   : > { %1639 = vmatprep.mubr.bf16.mxu1 %v1137_v50 }
 0x320   : > { %1640 = vmatmul.mubr.bf16.gmra.mrb[36].mxu1 %v1138_v49 }
 0x323   : > { %v1613_v51 = vpop.f32.mrb[44].mxu0 }
 0x324   : > { %v1098_v52 = vmul.f32 %v1613_v51, %v2288_v10  ;;  %v1068_v53 = vpop.f32.mrb[45].mxu0 }
 0x325   : > { %v1096_v54 = vmul.f32 %v2288_v10, %v1068_v53  ;;  %v1614_v55 = vpop.f32.mrb[46].mxu0 }
 0x326   : > { %v1115_v56 = vadd.f32 %v2293_v59, %v1098_v52  ;;  %v1099_v57 = vmul.f32 %v1614_v55, %v2288_v10  ;;  %v1071_v58 = vpop.f32.mrb[47].mxu0 }
 0x327   : > { %v1113_v13 = vadd.f32 %v2293_v59, %v1096_v54  ;;  %v1097_v60 = vmul.f32 %v2288_v10, %v1071_v58 }
 0x328   : > { %v1116_v61 = vadd.f32 %v2293_v59, %v1099_v57  ;;  %v1131_v63 = vmax.f32 %v1115_v56, 0.0 }
 0x329   : > { %v1114_v62 = vadd.f32 %v2293_v59, %v1097_v60  ;;  %v1129_v1 = vmax.f32 %v1113_v13, 0.0 }
 0x32a   : > { %v1132_v0 = vmax.f32 %v1116_v61, 0.0 }
 0x32b   : > { %v1130_v38 = vmax.f32 %v1114_v62, 0.0 }
 0x32c   : > { %v1140_v2 = vpack.c.bf16 %v1132_v0, %v1131_v63 }
 0x32d   : > { %v1139_v39 = vpack.c.bf16 %v1130_v38, %v1129_v1 }
 0x32f   : > { %1643 = vmatprep.mubr.bf16.mxu1 %v1139_v39 }
 0x330   : > { %1644 = vmatmul.mubr.bf16.gmra.mrb[40].mxu1 %v1140_v2 }
 0x3d3   : > { %v1633_v10 = vpop.f32.mrb[48].mxu0 }
 0x3d4   : > { %v1249_v42 = vadd.f32 %v1633_v10, %v1157_v40  ;;  %v1240_v3 = vpop.f32.mrb[49].mxu0 }
 0x3d5   : > { %v1241_v4 = vadd.f32 %v1240_v3, %v1157_v40  ;;  %v1634_v59 = vpop.f32.mrb[50].mxu0 }
 0x3d6   : > { %1305 = vst [vmem:[%s2333_s14 + $0x10] sm:$0xff] %v1249_v42  ;;  %v1252_v5 = vadd.f32 %v1634_v59, %v1157_v40  ;;  %v1243_v8 = vpop.f32.mrb[51].mxu0 }
 0x3d7   : > { %1303 = vst [vmem:[%s2333_s14] sm:$0xff] %v1241_v4  ;;  %v1244_v9 = vadd.f32 %v1243_v8, %v1157_v40 }
 0x3d8   : > { %1306 = vst [vmem:[%s2333_s14 + $0x18] sm:$0xff] %v1252_v5 }
 0x3d9   : > { %1304 = vst [vmem:[%s2333_s14 + $0x8] sm:$0xff] %v1244_v9 }
 0x3e3   : > { %v1637_v11 = vpop.f32.mrb[32].mxu1 }
 0x3e4   : > { %v1265_v12 = vadd.f32 %v1637_v11, %v1157_v40  ;;  %v1256_v14 = vpop.f32.mrb[33].mxu1 }
 0x3e5   : > { %v1257_v15 = vadd.f32 %v1256_v14, %v1157_v40  ;;  %v1638_v6 = vpop.f32.mrb[34].mxu1 }
 0x3e6   : > { %1309 = vst [vmem:[%s2333_s14 + $0x30] sm:$0xff] %v1265_v12  ;;  %v1268_v16 = vadd.f32 %v1638_v6, %v1157_v40  ;;  %v1259_v17 = vpop.f32.mrb[35].mxu1 }
 0x3e7   : > { %1307 = vst [vmem:[%s2333_s14 + $0x20] sm:$0xff] %v1257_v15  ;;  %v1260_v18 = vadd.f32 %v1259_v17, %v1157_v40 }
 0x3e8   : > { %1310 = vst [vmem:[%s2333_s14 + $0x38] sm:$0xff] %v1268_v16 }
 0x3e9   : > { %1308 = vst [vmem:[%s2333_s14 + $0x28] sm:$0xff] %v1260_v18 }
 0x3f3   : > { %v1641_v19 = vpop.f32.mrb[36].mxu1 }
 0x3f4   : > { %v1281_v20 = vadd.f32 %v1641_v19, %v1157_v40  ;;  %v1272_v21 = vpop.f32.mrb[37].mxu1 }
 0x3f5   : > { %v1273_v22 = vadd.f32 %v1272_v21, %v1157_v40  ;;  %v1642_v7 = vpop.f32.mrb[38].mxu1 }
 0x3f6   : > { %1313 = vst [vmem:[%s2333_s14 + $0x50] sm:$0xff] %v1281_v20  ;;  %v1284_v23 = vadd.f32 %v1642_v7, %v1157_v40  ;;  %v1275_v24 = vpop.f32.mrb[39].mxu1 }
 0x3f7   : > { %1311 = vst [vmem:[%s2333_s14 + $0x40] sm:$0xff] %v1273_v22  ;;  %v1276_v25 = vadd.f32 %v1275_v24, %v1157_v40 }
 0x3f8   : > { %1314 = vst [vmem:[%s2333_s14 + $0x58] sm:$0xff] %v1284_v23 }
 0x3f9   : > { %1312 = vst [vmem:[%s2333_s14 + $0x48] sm:$0xff] %v1276_v25 }
 0x403   : > { %v1645_v26 = vpop.f32.mrb[40].mxu1 }
 0x404   : > { %v1297_v27 = vadd.f32 %v1645_v26, %v1157_v40  ;;  %v1288_v28 = vpop.f32.mrb[41].mxu1 }
 0x405   : > { %v1289_v29 = vadd.f32 %v1288_v28, %v1157_v40  ;;  %v1646_v30 = vpop.f32.mrb[42].mxu1 }
 0x406   : > { %1317 = vst [vmem:[%s2333_s14 + $0x70] sm:$0xff] %v1297_v27  ;;  %v1300_v31 = vadd.f32 %v1646_v30, %v1157_v40  ;;  %v1291_v32 = vpop.f32.mrb[43].mxu1 }
 0x407   : > { %1315 = vst [vmem:[%s2333_s14 + $0x60] sm:$0xff] %v1289_v29  ;;  %v1292_v33 = vadd.f32 %v1291_v32, %v1157_v40 }
 0x408   : > { %1318 = vst [vmem:[%s2333_s14 + $0x78] sm:$0xff] %v1300_v31 }
 0x409   : > { %1316 = vst [vmem:[%s2333_s14 + $0x68] sm:$0xff] %v1292_v33 }
 0x40a   : > { %1843 = shalt.err (!%p1840_p11)
}
 0x40b   : > { %s1844_s19 = scalar_lea.hbm %s2353_s18, 2048  ;;  %s1848_s12 = scalar_lea.hbm %s2409_s6, 4096 }
 0x40c   : > { %p1845_p13 = scmp.ne.s32.totalorder %s2353_s18, %s1844_s19  ;;  %p1849_p6 = scmp.lt.u32.totalorder %s2353_s18, %s2409_s6 }
 0x40d   : > { %p1850_p9 = scmp.lt.u32.totalorder %s1848_s12, %s1844_s19  ;;  %p1852_p10 = scmp.lt.u32.totalorder %s1844_s19, %s2353_s18 }
 0x40e   : > { %p1846_p5 = pnand %p1845_p13, %p2422_p1 }
 0x40f   : > { %p1851_p12 = por %p1850_p9, %p1849_p6 }
 0x410   : > { %p1847_p0 = pneg %p1846_p5 }
 0x411   : > { %p1853_p2 = por %p1852_p10, %p1851_p12 }
 0x413   : > { %p1854_p3 = pnand %p1853_p2, %p1847_p0 }
 0x415   : > { %1857 = shalt.err (!%p1854_p3)
}
 0x416   : > { %s1908_s29 = smov 128   ;;  %s1909_s16 = smov 8  }
 0x417   : > { %1671 = dma.vmem_to_hbm [thread:$0]  (%p2422_p1), %s2355_s10, 2048, %s2353_s18, %s2362_s25, %s1908_s29, %s1908_s29, %s1909_s16  }
 0x418 PF: > { %p1688_p4 = scmp.ge.s32.totalorder %s1900_s24, 2  ;;  %s1348_s17 = sand.u32 1, %s1888_s21  }
 0x419   : > { %p2423_p7 = scmp.ne.s32.totalorder %s2414_s8, 0  ;;  %s1349_s20 = scalar_lea.sflag [#allocation4], %s1348_s17 }
 0x41b   : > { %p1681_p8 = pnand %p1688_p4, %p2423_p7 }
 0x41d   : > { %1883 = dma.done.wait (!%p1681_p8), %s1349_s20, 2048  }
 0x41e   : > { %1885 = vsyncadd (!%p1681_p8), %s1349_s20, 4294965248  ;;  %p18_p11 = scmp.ge.s32.totalorder %s1970_s27, 4   ;;  %s2424_s21 = smov %s1892_s22 }
 0x41f   : > { %s2425_s22 = smov %s1896_s23  ;;  %s2426_s23 = smov %s1981_s30 }
 0x420   : > { %s2427_s24 = smov %s1970_s27  ;;  %20 = sbr.rel (!%p18_p11) target bundleno = 5 (0x5), region = 89 }
 0x427   :  { %1354 = vsyncpa [#allocation3], 1 }
 0x428   :  { %1356 = vsyncpa [#allocation3 + $0x1], 1 }
 0x429   :  { %1357 = vsyncpa [#allocation6], 1 }
 0x42a   :  { %1358 = vsyncpa [#allocation4], 1 }
 0x42b   :  { %1360 = vsyncpa [#allocation4 + $0x1], 1 }

</bundles_post_ra>
